<compile_context>
chip_gen: v6e
topology: v6e:2x2x1
jax: 0.10.0
libtpu: 0.0.40
codegen_flags: <defaults>
</compile_context>

<pallas_src>
import functools

import jax
import jax.numpy as jnp
from jax.experimental import pallas as pl
from jax.experimental.pallas import tpu as pltpu


def _round_up(x: int, m: int) -> int:
    return ((x + m - 1) // m) * m


def _linear_bias_kernel(x_ref, w_ref, b_ref, o_ref, acc_ref):
    # x_ref: (tm, tk), w_ref: (tn, tk)  [native (C, D) layout],
    # b_ref: (1, tn),  o_ref: (tm, tn), acc_ref: (tm, tn) f32 scratch.
    k = pl.program_id(2)

    @pl.when(k == 0)
    def _init():
        acc_ref[...] = jnp.zeros_like(acc_ref)

    # Contract on the shared D axis (dim 1 of both operands) — no transpose.
    acc_ref[...] += jax.lax.dot_general(
        x_ref[...],
        w_ref[...],
        dimension_numbers=(((1,), (1,)), ((), ())),
        preferred_element_type=jnp.float32,
    )

    @pl.when(k == pl.num_programs(2) - 1)
    def _finalize():
        # Bias add folded into the epilogue (cheap VPU work under MXU slack).
        o_ref[...] = (acc_ref[...] + b_ref[...]).astype(o_ref.dtype)


def classifier_forward_pallas(x, weight, bias, *, tm=None, tn=None, tk=None):
    """y = x @ weight.T + bias via a tiled Pallas TPU matmul kernel.

    x:      (B, D) float32
    weight: (C, D) float32  (PyTorch nn.Linear layout, consumed as-is)
    bias:   (C,)   float32
    returns (B, C) float32
    """
    B, D = x.shape
    C, D2 = weight.shape
    assert D == D2, "weight must be (num_classes, input_dim)"
    assert bias.shape == (C,)

    # Tile sizes: sublane-aligned batch (multiple of 8), lane-dense class and
    # depth tiles (multiples of 128). These fit comfortably in the default
    # scoped VMEM on v5e/v6e/v7x (double-buffered inputs < 2 MiB total).
    if tm is None:
        tm = min(_round_up(B, 8), 128)
    if tn is None:
        tn = min(_round_up(C, 128), 256)
    if tk is None:
        tk = min(_round_up(D, 128), 512)

    Bp = _round_up(B, tm)
    Cp = _round_up(C, tn)
    Dp = _round_up(D, tk)

    # Zero-padding is semantically neutral: padded D contributes 0 to the dot
    # product; padded B/C rows/cols are sliced off below.
    x_p = x if (Bp == B and Dp == D) else jnp.pad(x, ((0, Bp - B), (0, Dp - D)))
    w_p = (
        weight
        if (Cp == C and Dp == D)
        else jnp.pad(weight, ((0, Cp - C), (0, Dp - D)))
    )
    b_p = (bias if Cp == C else jnp.pad(bias, (0, Cp - C))).reshape(1, Cp)

    grid = (Bp // tm, Cp // tn, Dp // tk)

    out = pl.pallas_call(
        _linear_bias_kernel,
        out_shape=jax.ShapeDtypeStruct((Bp, Cp), x.dtype),
        grid_spec=pltpu.PrefetchScalarGridSpec(
            num_scalar_prefetch=0,
            grid=grid,
            in_specs=[
                pl.BlockSpec((tm, tk), lambda i, j, k: (i, k)),   # x tile
                pl.BlockSpec((tn, tk), lambda i, j, k: (j, k)),   # weight tile (C, D)
                pl.BlockSpec((1, tn), lambda i, j, k: (0, j)),    # bias (k-invariant)
            ],
            out_specs=pl.BlockSpec((tm, tn), lambda i, j, k: (i, j)),
            scratch_shapes=[pltpu.VMEM((tm, tn), jnp.float32)],
        ),
        compiler_params=pltpu.CompilerParams(
            dimension_semantics=("parallel", "parallel", "arbitrary"),
        ),
        cost_estimate=pl.CostEstimate(
            flops=2 * Bp * Cp * Dp,
            transcendentals=0,
            bytes_accessed=4 * (Bp * Dp + Cp * Dp + Cp + Bp * Cp),
        ),
    )(x_p, w_p, b_p)

    if Bp == B and Cp == C:
        return out
    return out[:B, :C]


def classifier_forward(x, weight, bias, *, force_pallas=False):
    """Public entry point. Falls back to fused XLA for tiny problems where a
    Pallas kernel is pure launch overhead; uses the tiled kernel otherwise."""
    B, D = x.shape
    C = weight.shape[0]
    # ~2*B*C*D FLOPs; below this the custom call cost dominates.
    small = (2 * B * C * D) < (1 << 22)
    if small and not force_pallas:
        return x @ weight.T + bias
    return classifier_forward_pallas(x, weight, bias)


if __name__ == "__main__":
    # Small, deterministic example shapes consistent with the module.
    batch = 4
    input_dim = 32
    num_classes = 8

    key = jax.random.PRNGKey(0)
    kx, kw, kb = jax.random.split(key, 3)

    x = jax.random.normal(kx, (batch, input_dim), dtype=jnp.float32)
    # Deterministic synthetic parameters (mimic nn.Linear's uniform init).
    bound = 1.0 / jnp.sqrt(jnp.float32(input_dim))
    weight = jax.random.uniform(
        kw, (num_classes, input_dim), dtype=jnp.float32, minval=-bound, maxval=bound
    )
    bias = jax.random.uniform(
        kb, (num_classes,), dtype=jnp.float32, minval=-bound, maxval=bound
    )

    # Force the Pallas path so the kernel itself is exercised at test shapes.
    fwd = jax.jit(functools.partial(classifier_forward, force_pallas=True))
    y = fwd(x, weight, bias)
    y = jax.block_until_ready(y)

    # Reference check against plain JAX.
    y_ref = x @ weight.T + bias
    assert y.shape == (batch, num_classes)
    assert jnp.allclose(y, y_ref, atol=1e-5, rtol=1e-5)

    print("KERNEL_OK")
</pallas_src>

<mosaic_0001>
module attributes {stable_mosaic.version = 11 : i64} {
  func.func @_linear_bias_kernel(%arg0: i32, %arg1: i32, %arg2: i32, %arg3: memref<8x128xf32, #tpu.memory_space<vmem>>, %arg4: memref<128x128xf32, #tpu.memory_space<vmem>>, %arg5: memref<1x128xf32, #tpu.memory_space<vmem>>, %arg6: memref<8x128xf32, #tpu.memory_space<vmem>>, %arg7: memref<8x128xf32, #tpu.memory_space<vmem>>) attributes {dimension_semantics = [#tpu.dimension_semantics<parallel>, #tpu.dimension_semantics<parallel>, #tpu.dimension_semantics<arbitrary>], iteration_bounds = array<i64: 1, 1, 1>, scalar_prefetch = 0 : i64, scratch_operands = 1 : i64, tpu.core_type = #tpu.core_type<tc>, window_params = [{transform_indices = @transform_0, window_bounds = array<i64: 8, 128>}, {transform_indices = @transform_1, window_bounds = array<i64: 128, 128>}, {transform_indices = @transform_2, window_bounds = array<i64: 1, 128>}, {transform_indices = @transform_3, window_bounds = array<i64: 8, 128>}]} {
    %c0_i32 = arith.constant 0 : i32
    %0 = arith.cmpi eq, %arg2, %c0_i32 : i32
    %1 = arith.extui %0 : i1 to i32
    %c0_i32_0 = arith.constant 0 : i32
    %2 = arith.cmpi ne, %1, %c0_i32_0 : i32
    scf.if %2 {
      %cst_10 = arith.constant 0.000000e+00 : f32
      %12 = vector.broadcast %cst_10 : f32 to vector<8x128xf32>
      %c0_11 = arith.constant 0 : index
      %c0_12 = arith.constant 0 : index
      %13 = vector.load %arg7[%c0_11, %c0_12] : memref<8x128xf32, #tpu.memory_space<vmem>>, vector<8x128xf32>
      tpu.vector_store %arg7[%c0_11, %c0_12], %12 {strides = array<i32>} : memref<8x128xf32, #tpu.memory_space<vmem>>, vector<8x128xf32>,
    } else {
    }
    %c0 = arith.constant 0 : index
    %c0_1 = arith.constant 0 : index
    %3 = vector.load %arg7[%c0, %c0_1] : memref<8x128xf32, #tpu.memory_space<vmem>>, vector<8x128xf32>
    %c0_2 = arith.constant 0 : index
    %c0_3 = arith.constant 0 : index
    %4 = vector.load %arg3[%c0_2, %c0_3] : memref<8x128xf32, #tpu.memory_space<vmem>>, vector<8x128xf32>
    %c0_4 = arith.constant 0 : index
    %c0_5 = arith.constant 0 : index
    %5 = vector.load %arg4[%c0_4, %c0_5] : memref<128x128xf32, #tpu.memory_space<vmem>>, vector<128x128xf32>
    %cst = arith.constant dense<0.000000e+00> : vector<8x128xf32>
    %6 = tpu.matmul %4, %5, %cst {dimension_numbers = #tpu.dot_dimension_numbers<[1], [1], [0], [0], [0, 0, 1, 0], [], []>} : vector<8x128xf32>, vector<128x128xf32>, vector<8x128xf32> -> vector<8x128xf32>
    %7 = arith.addf %3, %6 : vector<8x128xf32>
    %c0_6 = arith.constant 0 : index
    %c0_7 = arith.constant 0 : index
    %8 = vector.load %arg7[%c0_6, %c0_7] : memref<8x128xf32, #tpu.memory_space<vmem>>, vector<8x128xf32>
    tpu.vector_store %arg7[%c0_6, %c0_7], %7 {strides = array<i32>} : memref<8x128xf32, #tpu.memory_space<vmem>>, vector<8x128xf32>,
    %c0_i32_8 = arith.constant 0 : i32
    %9 = arith.cmpi eq, %arg2, %c0_i32_8 : i32
    %10 = arith.extui %9 : i1 to i32
    %c0_i32_9 = arith.constant 0 : i32
    %11 = arith.cmpi ne, %10, %c0_i32_9 : i32
    scf.if %11 {
      %c0_10 = arith.constant 0 : index
      %c0_11 = arith.constant 0 : index
      %12 = vector.load %arg7[%c0_10, %c0_11] : memref<8x128xf32, #tpu.memory_space<vmem>>, vector<8x128xf32>
      %c0_12 = arith.constant 0 : index
      %c0_13 = arith.constant 0 : index
      %13 = vector.load %arg5[%c0_12, %c0_13] : memref<1x128xf32, #tpu.memory_space<vmem>>, vector<1x128xf32>
      %14 = vector.broadcast %13 : vector<1x128xf32> to vector<8x128xf32>
      %15 = arith.addf %12, %14 : vector<8x128xf32>
      %c0_14 = arith.constant 0 : index
      %c0_15 = arith.constant 0 : index
      %16 = vector.load %arg6[%c0_14, %c0_15] : memref<8x128xf32, #tpu.memory_space<vmem>>, vector<8x128xf32>
      tpu.vector_store %arg6[%c0_14, %c0_15], %15 {strides = array<i32>} : memref<8x128xf32, #tpu.memory_space<vmem>>, vector<8x128xf32>,
    } else {
    }
    return
  }
  func.func @transform_0(%arg0: i32, %arg1: i32, %arg2: i32) -> (i32, i32) {
    %c0_i32 = arith.constant 0 : i32
    return %arg0, %arg2 : i32, i32
  }
  func.func @transform_1(%arg0: i32, %arg1: i32, %arg2: i32) -> (i32, i32) {
    %c0_i32 = arith.constant 0 : i32
    return %arg1, %arg2 : i32, i32
  }
  func.func @transform_2(%arg0: i32, %arg1: i32, %arg2: i32) -> (i32, i32) {
    %c0_i32 = arith.constant 0 : i32
    %c0_i32_0 = arith.constant 0 : i32
    return %c0_i32, %arg1 : i32, i32
  }
  func.func @transform_3(%arg0: i32, %arg1: i32, %arg2: i32) -> (i32, i32) {
    %c0_i32 = arith.constant 0 : i32
    return %arg0, %arg1 : i32, i32
  }
}

</mosaic_0001>

<bundles_post_ra>
// kernel: classifier_forward.1
= control target key start
LH: loop header
LB: loop body
LE: loop exit
PB: predicated region body
PF: predicated region fallthrough
CT: control target
= control target key end

     0   :  { %v181_v0 = vmov 0.0   ;;  %vm182_vm0 = vmmov 0   ;;  %s260_s1 = inlined_call_operand.vmem [shape: f32[128,128], index: 1, kind: input, shape index: {}]   ;;  %s261_s0 = inlined_call_operand.vmem [shape: f32[8,128], index: 0, kind: input, shape index: {}]   ;;  %s262_s2 = inlined_call_operand.vmem [shape: f32[1,128], index: 2, kind: input, shape index: {}]   ;;  %s263_s3 = inlined_call_operand.vmem [shape: f32[8,128], index: 3, kind: output, shape index: {}]  }
   0x1   :  { %144 = vmatprep.subr.mxu0 %v181_v0  ;;  %v36_v1 = vld [vmem:[%s260_s1 + $0x78] sm:$0xff]  ;;  %176 = vmatprep.mubr.msk.f32.mxu0 %vm182_vm0, %v181_v0  ;;  %v35_v2 = vld [vmem:[%s260_s1 + $0x70] sm:$0xff]  ;;  %v34_v3 = vld [vmem:[%s260_s1 + $0x68] sm:$0xff] }
   0x2   :  { %145 = vmatpush3.xpose.msra.mxu0 %v36_v1  ;;  %v33_v4 = vld [vmem:[%s260_s1 + $0x60] sm:$0xff]  ;;  %v32_v5 = vld [vmem:[%s260_s1 + $0x58] sm:$0xff]  ;;  %v31_v6 = vld [vmem:[%s260_s1 + $0x50] sm:$0xff] }
   0x3   :  { %146 = vmatprep.subr.mxu0 %v181_v0  ;;  %v30_v7 = vld [vmem:[%s260_s1 + $0x48] sm:$0xff]  ;;  %v29_v8 = vld [vmem:[%s260_s1 + $0x40] sm:$0xff]  ;;  %v28_v9 = vld [vmem:[%s260_s1 + $0x38] sm:$0xff] }
   0x4   :  { %v27_v10 = vld [vmem:[%s260_s1 + $0x30] sm:$0xff]  ;;  %v26_v11 = vld [vmem:[%s260_s1 + $0x28] sm:$0xff]  ;;  %v25_v12 = vld [vmem:[%s260_s1 + $0x20] sm:$0xff] }
   0x5   :  { %v24_v13 = vld [vmem:[%s260_s1 + $0x18] sm:$0xff]  ;;  %v23_v14 = vld [vmem:[%s260_s1 + $0x10] sm:$0xff]  ;;  %v22_v15 = vld [vmem:[%s260_s1 + $0x8] sm:$0xff] }
   0x6   :  { %147 = vmatpush3.xpose.msra.mxu0 %v35_v2  ;;  %v21_v16 = vld [vmem:[%s260_s1] sm:$0xff] }
   0x7   :  { %148 = vmatprep.subr.mxu0 %v181_v0  ;;  %v20_v17 = vld [vmem:[%s261_s0] sm:$0xff] }
   0x8   :  { %v126_v18 = vld [vmem:[%s262_s2] ss:$0 sm:$0xff] }
   0xa   :  { %149 = vmatpush3.xpose.msra.mxu0 %v34_v3 }
   0xb   :  { %150 = vmatprep.subr.mxu0 %v181_v0 }
   0xe   :  { %151 = vmatpush3.xpose.msra.mxu0 %v33_v4 }
   0xf   :  { %152 = vmatprep.subr.mxu0 %v181_v0 }
  0x12   :  { %153 = vmatpush3.xpose.msra.mxu0 %v32_v5 }
  0x13   :  { %154 = vmatprep.subr.mxu0 %v181_v0 }
  0x16   :  { %155 = vmatpush3.xpose.msra.mxu0 %v31_v6 }
  0x17   :  { %156 = vmatprep.subr.mxu0 %v181_v0 }
  0x1a   :  { %157 = vmatpush3.xpose.msra.mxu0 %v30_v7 }
  0x1b   :  { %158 = vmatprep.subr.mxu0 %v181_v0 }
  0x1e   :  { %159 = vmatpush3.xpose.msra.mxu0 %v29_v8 }
  0x1f   :  { %160 = vmatprep.subr.mxu0 %v181_v0 }
  0x22   :  { %161 = vmatpush3.xpose.msra.mxu0 %v28_v9 }
  0x23   :  { %162 = vmatprep.subr.mxu0 %v181_v0 }
  0x26   :  { %163 = vmatpush3.xpose.msra.mxu0 %v27_v10 }
  0x27   :  { %164 = vmatprep.subr.mxu0 %v181_v0 }
  0x2a   :  { %165 = vmatpush3.xpose.msra.mxu0 %v26_v11 }
  0x2b   :  { %166 = vmatprep.subr.mxu0 %v181_v0 }
  0x2e   :  { %167 = vmatpush3.xpose.msra.mxu0 %v25_v12 }
  0x2f   :  { %168 = vmatprep.subr.mxu0 %v181_v0 }
  0x32   :  { %169 = vmatpush3.xpose.msra.mxu0 %v24_v13 }
  0x33   :  { %170 = vmatprep.subr.mxu0 %v181_v0 }
  0x36   :  { %171 = vmatpush3.xpose.msra.mxu0 %v23_v14 }
  0x37   :  { %172 = vmatprep.subr.mxu0 %v181_v0 }
  0x3a   :  { %173 = vmatpush3.xpose.msra.mxu0 %v22_v15 }
  0x3b   :  { %174 = vmatprep.subr.mxu0 %v181_v0 }
  0x3e   :  { %175 = vmatpush3.xpose.msra.mxu0 %v21_v16 }
  0x41   :  { %177 = vmatmul.mubr.f32.vlgmr.msra.gmra.mxu0 %v20_v17 }
 0x101   :  { %v103_v19 = vpop.f32.mrf.mxu0 }
 0x102   :  { %v120_v20 = vadd.f32 %v126_v18, %v103_v19 }
 0x103   :  { %v178_v21 = vpop.f32.mrf.mxu0 }
 0x104   :  { %121 = vst [vmem:[%s263_s3] sm:$0xff] %v120_v20 }

</bundles_post_ra>
